<compile_context>
chip_gen: v7x
topology: tpu7x:2x2x1
jax: 0.10.0
libtpu: 0.0.40
codegen_flags: <defaults>
</compile_context>

<pallas_src>
import jax
import jax.numpy as jnp
from jax.experimental import pallas as pl
from jax.experimental.pallas import tpu as pltpu


def _round_up(x, m):
    return ((x + m - 1) // m) * m


# ----------------------------------------------------------------------------
# Kernel 1: per-node projections  s = [z @ W1 ; z @ W2]   -> (2, N) lane-dense
# ----------------------------------------------------------------------------
def _node_proj_kernel(z_ref, w_ref, out_ref):
    # (2, d) x (tile_n, d) contracting d-with-d -> (2, tile_n); output is
    # lane-dense over the node axis (no width-1 MXU result).
    out_ref[...] = jax.lax.dot_general(
        w_ref[...], z_ref[...],
        dimension_numbers=(((1,), (1,)), ((), ())),
        preferred_element_type=jnp.float32,
    ).astype(out_ref.dtype)


# ----------------------------------------------------------------------------
# Kernel 2: per-edge combine  value = s_src + s_dst + b   -> (1, E) lane-dense
# ----------------------------------------------------------------------------
def _edge_combine_kernel(b_ref, ssrc_ref, sdst_ref, out_ref):
    out_ref[...] = ssrc_ref[...] + sdst_ref[...] + b_ref[0]


def inner_product_decoder_forward(z, edge_index, weight, bias,
                                  *, tile_n=512, tile_e=512):
    """z: (N, d) f32; edge_index: (2, E) i32; weight: (1, 2d); bias: (1,).

    Returns (E, 1) f32, matching torch's fc(cat(z[src], z[dst], dim=1)).
    """
    n, d = z.shape
    e = edge_index.shape[1]

    # Split Linear weight: torch computes x @ W.T + b, W of shape (1, 2d).
    # Row 0 multiplies z[src], row 1 multiplies z[dst].
    w12 = weight.reshape(2, d).astype(jnp.float32)          # (2, d)

    # --- per-node projection (tiled over nodes, handles any N via padding) ---
    n_pad = _round_up(n, tile_n)
    z_pad = jnp.pad(z.astype(jnp.float32), ((0, n_pad - n), (0, 0)))

    s = pl.pallas_call(
        _node_proj_kernel,
        out_shape=jax.ShapeDtypeStruct((2, n_pad), jnp.float32),
        grid_spec=pltpu.PrefetchScalarGridSpec(
            num_scalar_prefetch=0,
            grid=(n_pad // tile_n,),
            in_specs=[
                pl.BlockSpec((tile_n, d), lambda i: (i, 0)),
                pl.BlockSpec((2, d), lambda i: (0, 0)),
            ],
            out_specs=pl.BlockSpec((2, tile_n), lambda i: (0, i)),
        ),
        compiler_params=pltpu.CompilerParams(
            dimension_semantics=("parallel",)),
    )(z_pad, w12)

    # --- glue: gather E scalars per endpoint (4*E bytes each, not (E, d)) ---
    s_src = s[0, edge_index[0]]                              # (E,)
    s_dst = s[1, edge_index[1]]                              # (E,)

    # --- lane-dense edge combine (+ bias from SMEM) ---
    e_pad = _round_up(e, tile_e)
    s_src_p = jnp.pad(s_src, (0, e_pad - e)).reshape(1, e_pad)
    s_dst_p = jnp.pad(s_dst, (0, e_pad - e)).reshape(1, e_pad)
    b = bias.reshape(1).astype(jnp.float32)

    val = pl.pallas_call(
        _edge_combine_kernel,
        out_shape=jax.ShapeDtypeStruct((1, e_pad), jnp.float32),
        grid_spec=pltpu.PrefetchScalarGridSpec(
            num_scalar_prefetch=0,
            grid=(e_pad // tile_e,),
            in_specs=[
                pl.BlockSpec(memory_space=pltpu.MemorySpace.SMEM),  # bias scalar
                pl.BlockSpec((1, tile_e), lambda i: (0, i)),
                pl.BlockSpec((1, tile_e), lambda i: (0, i)),
            ],
            out_specs=pl.BlockSpec((1, tile_e), lambda i: (0, i)),
        ),
        compiler_params=pltpu.CompilerParams(
            dimension_semantics=("parallel",)),
    )(b, s_src_p, s_dst_p)

    return val[0, :e].reshape(e, 1)


# ----------------------------------------------------------------------------
# forward_all: sigmoid(z @ z.T), tiled (tm, tn) with row-major operands only.
# ----------------------------------------------------------------------------
def inner_product_decoder_forward_all(z, *, sigmoid=True, tile=256):
    """z: (N, d) -> (N, N) f32 = sigmoid(z @ z.T) (or raw scores if not sigmoid).

    `tile` must be a multiple of 128; keep <= 1024 on v7x (64 MiB VMEM).
    """
    n, d = z.shape
    n_pad = _round_up(n, tile)
    z_pad = jnp.pad(z.astype(jnp.float32), ((0, n_pad - n), (0, 0)))

    def kernel(za_ref, zb_ref, out_ref):
        # (tm, d) x (tn, d) contracting d-with-d -> (tm, tn); no transpose
        # materialized anywhere (MXU handles the transposed contraction).
        adj = jax.lax.dot_general(
            za_ref[...], zb_ref[...],
            dimension_numbers=(((1,), (1,)), ((), ())),
            preferred_element_type=jnp.float32,
        )
        if sigmoid:
            adj = jax.nn.sigmoid(adj)
        # NOTE(v6e): casting operands/output to bf16 would roughly halve HBM
        # traffic; kept f32 to exactly match the PyTorch reference precision.
        out_ref[...] = adj.astype(out_ref.dtype)

    out = pl.pallas_call(
        kernel,
        out_shape=jax.ShapeDtypeStruct((n_pad, n_pad), jnp.float32),
        grid_spec=pltpu.PrefetchScalarGridSpec(
            num_scalar_prefetch=0,
            grid=(n_pad // tile, n_pad // tile),
            in_specs=[
                pl.BlockSpec((tile, d), lambda i, j: (i, 0)),
                pl.BlockSpec((tile, d), lambda i, j: (j, 0)),
            ],
            out_specs=pl.BlockSpec((tile, tile), lambda i, j: (i, j)),
        ),
        compiler_params=pltpu.CompilerParams(
            dimension_semantics=("parallel", "parallel")),
    )(z_pad, z_pad)

    return out[:n, :n]


if __name__ == "__main__":
    key = jax.random.PRNGKey(0)
    k_z, k_w, k_b, k_e = jax.random.split(key, 4)

    N = 16            # number of nodes
    D = 32            # node_hidden_dim
    E = 8             # number of edges

    # Latent codes and deterministic parameter init (Linear(2D, 1)).
    z = jax.random.normal(k_z, (N, D), dtype=jnp.float32)
    bound = 1.0 / jnp.sqrt(2.0 * D)
    weight = jax.random.uniform(k_w, (1, 2 * D), jnp.float32, -bound, bound)
    bias = jax.random.uniform(k_b, (1,), jnp.float32, -bound, bound)
    edge_index = jax.random.randint(k_e, (2, E), 0, N, dtype=jnp.int32)

    # Pallas forward
    value = inner_product_decoder_forward(z, edge_index, weight, bias)
    value = jax.block_until_ready(value)

    # Reference (plain JAX) for sanity check
    z_in = jnp.concatenate([z[edge_index[0]], z[edge_index[1]]], axis=1)
    ref = z_in @ weight.T + bias
    assert value.shape == (E, 1)
    assert jnp.allclose(value, ref, atol=1e-5, rtol=1e-5)

    # forward_all check
    adj = jax.block_until_ready(inner_product_decoder_forward_all(z))
    adj_ref = jax.nn.sigmoid(z @ z.T)
    assert adj.shape == (N, N)
    assert jnp.allclose(adj, adj_ref, atol=1e-5, rtol=1e-5)

    # raw-score path (sigmoid=False) check
    raw = jax.block_until_ready(inner_product_decoder_forward_all(z, sigmoid=False))
    assert jnp.allclose(raw, z @ z.T, atol=1e-4, rtol=1e-5)

    print("KERNEL_OK")
</pallas_src>

<mosaic_0001>
module attributes {stable_mosaic.version = 11 : i64} {
  func.func @_node_proj_kernel(%arg0: i32, %arg1: memref<512x32xf32, #tpu.memory_space<vmem>>, %arg2: memref<2x32xf32, #tpu.memory_space<vmem>>, %arg3: memref<2x512xf32, #tpu.memory_space<vmem>>) attributes {dimension_semantics = [#tpu.dimension_semantics<parallel>], iteration_bounds = array<i64: 1>, scalar_prefetch = 0 : i64, scratch_operands = 0 : i64, tpu.core_type = #tpu.core_type<tc>, window_params = [{transform_indices = @transform_0, window_bounds = array<i64: 512, 32>}, {pipeline_mode = #tpu.pipeline_mode<synchronous>, transform_indices = @transform_1, window_bounds = array<i64: 2, 32>}, {transform_indices = @transform_2, window_bounds = array<i64: 2, 512>}]} {
    %c0 = arith.constant 0 : index
    %c0_0 = arith.constant 0 : index
    %0 = vector.load %arg2[%c0, %c0_0] : memref<2x32xf32, #tpu.memory_space<vmem>>, vector<2x32xf32>
    %c0_1 = arith.constant 0 : index
    %c0_2 = arith.constant 0 : index
    %1 = vector.load %arg1[%c0_1, %c0_2] : memref<512x32xf32, #tpu.memory_space<vmem>>, vector<512x32xf32>
    %cst = arith.constant dense<0.000000e+00> : vector<2x512xf32>
    %2 = tpu.matmul %0, %1, %cst {dimension_numbers = #tpu.dot_dimension_numbers<[1], [1], [0], [0], [0, 0, 1, 0], [], []>} : vector<2x32xf32>, vector<512x32xf32>, vector<2x512xf32> -> vector<2x512xf32>
    %c0_3 = arith.constant 0 : index
    %c0_4 = arith.constant 0 : index
    %3 = vector.load %arg3[%c0_3, %c0_4] : memref<2x512xf32, #tpu.memory_space<vmem>>, vector<2x512xf32>
    tpu.vector_store %arg3[%c0_3, %c0_4], %2 {strides = array<i32>} : memref<2x512xf32, #tpu.memory_space<vmem>>, vector<2x512xf32>,
    return
  }
  func.func @transform_0(%arg0: i32) -> (i32, i32) {
    %c0_i32 = arith.constant 0 : i32
    %c0_i32_0 = arith.constant 0 : i32
    return %arg0, %c0_i32 : i32, i32
  }
  func.func @transform_1(%arg0: i32) -> (i32, i32) {
    %c0_i32 = arith.constant 0 : i32
    %c0_i32_0 = arith.constant 0 : i32
    %c0_i32_1 = arith.constant 0 : i32
    return %c0_i32, %c0_i32_0 : i32, i32
  }
  func.func @transform_2(%arg0: i32) -> (i32, i32) {
    %c0_i32 = arith.constant 0 : i32
    %c0_i32_0 = arith.constant 0 : i32
    return %c0_i32, %arg0 : i32, i32
  }
}

</mosaic_0001>

<bundles_post_ra>
// kernel: tpu_custom_call.1
= control target key start
LH: loop header
LB: loop body
LE: loop exit
PB: predicated region body
PF: predicated region fallthrough
CT: control target
= control target key end

     0   :  { %vm77_vm0 = vcmask 261120   ;;  %s1012_s0 = inlined_call_operand.vmem [shape: f32[512,32], index: 0, kind: input, shape index: {}]   ;;  %s1013_s1 = inlined_call_operand.vmem [shape: f32[2,32], index: 1, kind: input, shape index: {}]   ;;  %s1014_s2 = inlined_call_operand.hbm [shape: f32[2,512], index: 2, kind: output, shape index: {}]  }
   0x1   :  { %v29_v0 = vld [vmem:[%s1012_s0 + $0x80] sm:$0xff]  ;;  %v30_v1 = vld [vmem:[%s1012_s0 + $0x88] sm:$0xff]  ;;  %vm736_vm1 = vmpackc.low %vm77_vm0, %vm77_vm0 }
   0x2   :  { %v61_v2 = vld [vmem:[%s1012_s0 + $0x180] sm:$0xff]  ;;  %v586_v3 = vpack.c.bf16 %v30_v1, %v29_v0  ;;  %v62_v5 = vld [vmem:[%s1012_s0 + $0x188] sm:$0xff]  ;;  %v31_v13 = vld [vmem:[%s1012_s0 + $0x90] sm:$0xff] }
   0x3   :  { %v13_v6 = vld [vmem:[%s1012_s0] sm:$0xff]  ;;  %v634_v7 = vpack.c.bf16 %v62_v5, %v61_v2  ;;  %v14_v8 = vld [vmem:[%s1012_s0 + $0x8] sm:$0xff]  ;;  %v32_v14 = vld [vmem:[%s1012_s0 + $0x98] sm:$0xff] }
   0x4   :  { %v45_v9 = vld [vmem:[%s1012_s0 + $0x100] sm:$0xff]  ;;  %v46_v10 = vld [vmem:[%s1012_s0 + $0x108] sm:$0xff]  ;;  %588 = vmatprep.subr.msk.bf16.mxu0 %vm736_vm1, %v586_v3  ;;  %v589_v11 = vpack.c.bf16 %v14_v8, %v13_v6  ;;  %v63_v15 = vld [vmem:[%s1012_s0 + $0x190] sm:$0xff]  ;;  %v592_v16 = vpack.c.bf16 %v32_v14, %v31_v13 }
   0x5   :  { %v637_v12 = vpack.c.bf16 %v46_v10, %v45_v9  ;;  %636 = vmatprep.subr.msk.bf16.mxu1 %vm736_vm1, %v634_v7  ;;  %v64_v17 = vld [vmem:[%s1012_s0 + $0x198] sm:$0xff]  ;;  %v15_v19 = vld [vmem:[%s1012_s0 + $0x10] sm:$0xff]  ;;  %v33_v23 = vld [vmem:[%s1012_s0 + $0xa0] sm:$0xff] }
   0x6   :  { %591 = vmatpush3.bf16.xpose.msk.msra.mxu0 %vm736_vm1, %v589_v11  ;;  %v640_v18 = vpack.c.bf16 %v64_v17, %v63_v15  ;;  %v16_v20 = vld [vmem:[%s1012_s0 + $0x18] sm:$0xff]  ;;  %v47_v21 = vld [vmem:[%s1012_s0 + $0x110] sm:$0xff]  ;;  %v34_v24 = vld [vmem:[%s1012_s0 + $0xa8] sm:$0xff] }
   0x7   :  { %639 = vmatpush3.bf16.xpose.msk.msra.mxu1 %vm736_vm1, %v637_v12  ;;  %594 = vmatprep.subr.msk.bf16.mxu0 %vm736_vm1, %v592_v16  ;;  %v48_v22 = vld [vmem:[%s1012_s0 + $0x118] sm:$0xff]  ;;  %v65_v25 = vld [vmem:[%s1012_s0 + $0x1a0] sm:$0xff]  ;;  %v66_v26 = vld [vmem:[%s1012_s0 + $0x1a8] sm:$0xff]  ;;  %v595_v27 = vpack.c.bf16 %v16_v20, %v15_v19  ;;  %v598_v29 = vpack.c.bf16 %v34_v24, %v33_v23 }
   0x8   :  { %642 = vmatprep.subr.msk.bf16.mxu1 %vm736_vm1, %v640_v18  ;;  %v643_v28 = vpack.c.bf16 %v48_v22, %v47_v21  ;;  %v646_v30 = vpack.c.bf16 %v66_v26, %v65_v25  ;;  %v17_v31 = vld [vmem:[%s1012_s0 + $0x20] sm:$0xff]  ;;  %v18_v32 = vld [vmem:[%s1012_s0 + $0x28] sm:$0xff]  ;;  %v35_v35 = vld [vmem:[%s1012_s0 + $0xb0] sm:$0xff] }
   0x9   :  { %v49_v33 = vld [vmem:[%s1012_s0 + $0x120] sm:$0xff]  ;;  %v50_v34 = vld [vmem:[%s1012_s0 + $0x128] sm:$0xff]  ;;  %v36_v36 = vld [vmem:[%s1012_s0 + $0xb8] sm:$0xff]  ;;  %v601_v39 = vpack.c.bf16 %v18_v32, %v17_v31 }
   0xa   :  { %v67_v37 = vld [vmem:[%s1012_s0 + $0x1b0] sm:$0xff]  ;;  %v68_v38 = vld [vmem:[%s1012_s0 + $0x1b8] sm:$0xff]  ;;  %v649_v40 = vpack.c.bf16 %v50_v34, %v49_v33  ;;  %v604_v41 = vpack.c.bf16 %v36_v36, %v35_v35  ;;  %v851_v46 = vld [vmem:[%s1013_s1] sm:$0x3] }
   0xb   :  { %v652_v42 = vpack.c.bf16 %v68_v38, %v67_v37  ;;  %v19_v43 = vld [vmem:[%s1012_s0 + $0x30] sm:$0xff]  ;;  %v20_v44 = vld [vmem:[%s1012_s0 + $0x38] sm:$0xff]  ;;  %v37_v48 = vld [vmem:[%s1012_s0 + $0xc0] sm:$0xff] }
   0xc   :  { %v51_v45 = vld [vmem:[%s1012_s0 + $0x130] sm:$0xff]  ;;  %v52_v47 = vld [vmem:[%s1012_s0 + $0x138] sm:$0xff] }
   0xe   :  { %597 = vmatpush3.bf16.xpose.msk.msra.mxu0 %vm736_vm1, %v595_v27 }
   0xf   :  { %645 = vmatpush3.bf16.xpose.msk.msra.mxu1 %vm736_vm1, %v643_v28  ;;  %600 = vmatprep.subr.msk.bf16.mxu0 %vm736_vm1, %v598_v29 }
  0x10   :  { %648 = vmatprep.subr.msk.bf16.mxu1 %vm736_vm1, %v646_v30 }
  0x16   :  { %603 = vmatpush3.bf16.xpose.msk.msra.mxu0 %vm736_vm1, %v601_v39 }
  0x17   :  { %651 = vmatpush3.bf16.xpose.msk.msra.mxu1 %vm736_vm1, %v649_v40  ;;  %606 = vmatprep.subr.msk.bf16.mxu0 %vm736_vm1, %v604_v41 }
  0x18   :  { %654 = vmatprep.subr.msk.bf16.mxu1 %vm736_vm1, %v652_v42 }
  0x19   :  { %7 = vsyncpa [#allocation3], 0  ;;  %v38_v49 = vld [vmem:[%s1012_s0 + $0xc8] sm:$0xff]  ;;  %v69_v50 = vld [vmem:[%s1012_s0 + $0x1c0] sm:$0xff]  ;;  %550 = vmatprep.mubr.msk.f32.mxu0 %vm77_vm0, %v851_v46  ;;  %584 = vmatprep.mubr.msk.f32.mxu1 %vm77_vm0, %v851_v46  ;;  %v607_v52 = vpack.c.bf16 %v20_v44, %v19_v43  ;;  %v655_v53 = vpack.c.bf16 %v52_v47, %v51_v45  ;;  %v708_v35 = vmov 1983009808   ;;  %v424_v37 = vlaneseq }
  0x1a   :  { %v70_v51 = vld [vmem:[%s1012_s0 + $0x1c8] sm:$0xff]  ;;  %v610_v54 = vpack.c.bf16 %v38_v49, %v37_v48  ;;  %v21_v56 = vld [vmem:[%s1012_s0 + $0x40] sm:$0xff]  ;;  %v39_v60 = vld [vmem:[%s1012_s0 + $0xd0] sm:$0xff]  ;;  %v422_v36 = vunpack.c.l.s4 %v708_v35 }
  0x1b   :  { %v658_v55 = vpack.c.bf16 %v70_v51, %v69_v50  ;;  %v22_v57 = vld [vmem:[%s1012_s0 + $0x48] sm:$0xff]  ;;  %v53_v58 = vld [vmem:[%s1012_s0 + $0x140] sm:$0xff]  ;;  %v40_v61 = vld [vmem:[%s1012_s0 + $0xd8] sm:$0xff]  ;;  %v425_v39 = vshrl.u32 %v424_v37, 7 }
  0x1c   :  { %v54_v59 = vld [vmem:[%s1012_s0 + $0x148] sm:$0xff]  ;;  %v71_v62 = vld [vmem:[%s1012_s0 + $0x1d0] sm:$0xff]  ;;  %v72_v63 = vld [vmem:[%s1012_s0 + $0x1d8] sm:$0xff]  ;;  %v613_v0 = vpack.c.bf16 %v22_v57, %v21_v56  ;;  %v616_v2 = vpack.c.bf16 %v40_v61, %v39_v60  ;;  %v423_v38 = vunpack.c.0.s8 %v422_v36 }
  0x1d   :  { %v661_v1 = vpack.c.bf16 %v54_v59, %v53_v58  ;;  %v664_v3 = vpack.c.bf16 %v72_v63, %v71_v62  ;;  %v23_v5 = vld [vmem:[%s1012_s0 + $0x50] sm:$0xff]  ;;  %v24_v6 = vld [vmem:[%s1012_s0 + $0x58] sm:$0xff]  ;;  %v41_v9 = vld [vmem:[%s1012_s0 + $0xe0] sm:$0xff] }
  0x1e   :  { %609 = vmatpush3.bf16.xpose.msk.msra.mxu0 %vm736_vm1, %v607_v52  ;;  %v55_v7 = vld [vmem:[%s1012_s0 + $0x150] sm:$0xff]  ;;  %v56_v8 = vld [vmem:[%s1012_s0 + $0x158] sm:$0xff]  ;;  %v42_v10 = vld [vmem:[%s1012_s0 + $0xe8] sm:$0xff]  ;;  %v619_v13 = vpack.c.bf16 %v24_v6, %v23_v5  ;;  %v426_v42 = vsub.s32 %v423_v38, %v425_v39 }
  0x1f   :  { %657 = vmatpush3.bf16.xpose.msk.msra.mxu1 %vm736_vm1, %v655_v53  ;;  %612 = vmatprep.subr.msk.bf16.mxu0 %vm736_vm1, %v610_v54  ;;  %v73_v11 = vld [vmem:[%s1012_s0 + $0x1e0] sm:$0xff]  ;;  %v74_v12 = vld [vmem:[%s1012_s0 + $0x1e8] sm:$0xff]  ;;  %v667_v14 = vpack.c.bf16 %v56_v8, %v55_v7  ;;  %v622_v15 = vpack.c.bf16 %v42_v10, %v41_v9  ;;  %v43_v21 = vld [vmem:[%s1012_s0 + $0xf0] sm:$0xff] }
  0x20   :  { %660 = vmatprep.subr.msk.bf16.mxu1 %vm736_vm1, %v658_v55  ;;  %v670_v16 = vpack.c.bf16 %v74_v12, %v73_v11  ;;  %v25_v17 = vld [vmem:[%s1012_s0 + $0x60] sm:$0xff]  ;;  %v26_v18 = vld [vmem:[%s1012_s0 + $0x68] sm:$0xff]  ;;  %v44_v22 = vld [vmem:[%s1012_s0 + $0xf8] sm:$0xff] }
  0x21   :  { %v57_v19 = vld [vmem:[%s1012_s0 + $0x160] sm:$0xff]  ;;  %v58_v20 = vld [vmem:[%s1012_s0 + $0x168] sm:$0xff]  ;;  %v75_v23 = vld [vmem:[%s1012_s0 + $0x1f0] sm:$0xff]  ;;  %v625_v25 = vpack.c.bf16 %v26_v18, %v25_v17  ;;  %v628_v27 = vpack.c.bf16 %v44_v22, %v43_v21 }
  0x22   :  { %v76_v24 = vld [vmem:[%s1012_s0 + $0x1f8] sm:$0xff]  ;;  %v673_v26 = vpack.c.bf16 %v58_v20, %v57_v19  ;;  %v27_v29 = vld [vmem:[%s1012_s0 + $0x70] sm:$0xff] }
  0x23   :  { %v676_v28 = vpack.c.bf16 %v76_v24, %v75_v23  ;;  %v28_v30 = vld [vmem:[%s1012_s0 + $0x78] sm:$0xff]  ;;  %v59_v31 = vld [vmem:[%s1012_s0 + $0x170] sm:$0xff] }
  0x24   :  { %v60_v32 = vld [vmem:[%s1012_s0 + $0x178] sm:$0xff]  ;;  %v631_v33 = vpack.c.bf16 %v28_v30, %v27_v29  ;;  %s709_s0 = smov [#allocation2]  }
  0x25   :  { %v679_v34 = vpack.c.bf16 %v60_v32, %v59_v31  ;;  %s444_s24 = sshll.u32 %s709_s0, 4  ;;  %s445_s24 = int_to_ptr.vmem [resolvable:$true] %s444_s24 }
  0x26   :  { %615 = vmatpush3.bf16.xpose.msk.msra.mxu0 %vm736_vm1, %v613_v0  ;;  %s684_s25 = scalar_lea.vmem %s445_s24, 128  ;;  %p689_p1 = scmp.lt.s32.totalorder %s445_s24, %s445_s24 }
  0x27   :  { %663 = vmatpush3.bf16.xpose.msk.msra.mxu1 %vm736_vm1, %v661_v1  ;;  %618 = vmatprep.subr.msk.bf16.mxu0 %vm736_vm1, %v616_v2  ;;  %p685_p0 = scmp.ne.s32.totalorder %s445_s24, %s684_s25  ;;  %p690_p2 = scmp.lt.s32.totalorder %s684_s25, %s684_s25 }
  0x28   :  { %666 = vmatprep.subr.msk.bf16.mxu1 %vm736_vm1, %v664_v3 }
  0x29   :  { %p691_p3 = por %p690_p2, %p689_p1 }
  0x2b   :  { %p692_p4 = pnand %p691_p3, %p685_p0 }
  0x2e   :  { %621 = vmatpush3.bf16.xpose.msk.msra.mxu0 %vm736_vm1, %v619_v13 }
  0x2f   :  { %669 = vmatpush3.bf16.xpose.msk.msra.mxu1 %vm736_vm1, %v667_v14  ;;  %624 = vmatprep.subr.msk.bf16.mxu0 %vm736_vm1, %v622_v15 }
  0x30   :  { %672 = vmatprep.subr.msk.bf16.mxu1 %vm736_vm1, %v670_v16 }
  0x36   :  { %627 = vmatpush3.bf16.xpose.msk.msra.mxu0 %vm736_vm1, %v625_v25 }
  0x37   :  { %675 = vmatpush3.bf16.xpose.msk.msra.mxu1 %vm736_vm1, %v673_v26  ;;  %630 = vmatprep.subr.msk.bf16.mxu0 %vm736_vm1, %v628_v27 }
  0x38   :  { %678 = vmatprep.subr.msk.bf16.mxu1 %vm736_vm1, %v676_v28 }
  0x3e   :  { %633 = vmatpush3.bf16.xpose.msk.msra.mxu0 %vm736_vm1, %v631_v33 }
  0x3f   :  { %681 = vmatpush3.bf16.xpose.msk.msra.mxu1 %vm736_vm1, %v679_v34 }
  0x45   :  { %551 = vmatmul.mubr.msk.f32.vlgmr.msra.gmra.mrb[0].mxu0 %vm77_vm0, %v851_v46 }
  0x46   :  { %585 = vmatmul.mubr.msk.f32.vlgmr.msra.gmra.mrb[0].mxu1 %vm77_vm0, %v851_v46 }
 0x118   :  { %v339_v40 = vpop.f32.mrb[0].mxu0 }
 0x119   :  { %v410_v41 = vpop.f32.mrb[0].mxu1  ;;  %v341_v43 = vpop.f32.mrb[1].mxu0 }
 0x11a   :  { %v412_v44 = vpop.f32.mrb[1].mxu1  ;;  %v419_v45 = vcombine.low %v339_v40, %v341_v43 }
 0x11b   :  { %v420_v47 = vcombine.low %v410_v41, %v412_v44 }
 0x11c   :  { %v427_v4 = vrot.slane %v419_v45, %v426_v42 }
 0x11d   :  { %v434_v48 = vrot.slane %v420_v47, %v426_v42 }
 0x11f   :  { %v435_v49 = vcombine.low %v427_v4, %v434_v48 }
 0x121   :  { %437 = vst [vmem:[#allocation2] sm:$0xff] %v435_v49 }
 0x122   :  { %695 = shalt.err (!%p692_p4)
}
 0x123   :  { %s696_s28 = scalar_lea.hbm %s1014_s2, 128 }
 0x124   :  { %p697_p5 = scmp.ne.s32.totalorder %s1014_s2, %s696_s28  ;;  %p700_p6 = scmp.lt.u32.totalorder %s696_s28, %s1014_s2 }
 0x126   :  { %p702_p7 = pnand %p700_p6, %p697_p5 }
 0x128   :  { %705 = shalt.err (!%p702_p7)
}
 0x129   :  { %447 = dma.vmem_to_hbm [thread:$0]  %s445_s24, 128, %s1014_s2, [#allocation3]  }
 0x12a   :  { %706 = dma.done.wait [#allocation3], 128  }
 0x12b   :  { %707 = vsyncadd [#allocation3], 4294967168 }
 0x12c   :  { %451 = vsyncpa [#allocation3], 1 }

</bundles_post_ra>
